<compile_context>
chip_gen: v6e
topology: v6e:2x2x1
jax: 0.10.0
libtpu: 0.0.40
codegen_flags: <defaults>
</compile_context>

<pallas_src>
import math

import jax
import jax.numpy as jnp
from jax.experimental import pallas as pl
from jax.experimental.pallas import tpu as pltpu


def _make_uda_kernel(batch, tb):
    """Build the per-tile kernel with the true batch size / tile rows baked in."""

    def kernel(x_ref, xh_ref, w_ref, b_ref, out_ref):
        # x_ref, xh_ref : (tb, D)      native-dtype activation tiles (pipelined)
        # w_ref         : (D, NCLASS)  bf16 weights (constant index_map -> resident)
        # b_ref         : (1, NCLASS)  f32 bias (resident)
        # out_ref       : (8, 128)     f32 lane-dense per-tile partial-sum slab
        i = pl.program_id(0)
        w = w_ref[...]
        bias = b_ref[...]

        # Cast to bf16 only here, right before the MXU dots; f32 accumulation.
        x_bf = x_ref[...].astype(jnp.bfloat16)
        xh_bf = xh_ref[...].astype(jnp.bfloat16)
        logits_x = jnp.dot(x_bf, w, preferred_element_type=jnp.float32) + bias
        logits_xh = jnp.dot(xh_bf, w, preferred_element_type=jnp.float32) + bias

        # Rows past the true batch size (last partial tile reads unspecified
        # VMEM) get zeroed logits in BOTH branches -> their KL contribution is
        # exactly zero and no NaN/Inf can leak into the tile sum.
        row = jax.lax.broadcasted_iota(jnp.int32, (tb, 1), 0)
        valid = (i * tb + row) < batch
        logits_x = jnp.where(valid, logits_x, 0.0)
        logits_xh = jnp.where(valid, logits_xh, 0.0)

        # --- softmax(model(x), dim=1): one exp feeds both p and log p.
        m_x = jnp.max(logits_x, axis=-1, keepdims=True)
        s_x = logits_x - m_x
        e_x = jnp.exp(s_x)
        denom_x = jnp.sum(e_x, axis=-1, keepdims=True)
        p = e_x / denom_x                       # exact divide; off the critical path
        log_p = s_x - jnp.log(denom_x)          # log(pred_x)

        # --- log_softmax(model(x_h), dim=1)
        m_h = jnp.max(logits_xh, axis=-1, keepdims=True)
        s_h = logits_xh - m_h
        log_q = s_h - jnp.log(jnp.sum(jnp.exp(s_h), axis=-1, keepdims=True))

        # --- kl_div(log_q, p, reduction='sum') partial for this tile.
        row_kl = jnp.sum(p * (log_p - log_q), axis=-1, keepdims=True)   # (tb, 1)
        tile_sum = jnp.sum(jnp.where(valid, row_kl, 0.0))
        out_ref[...] = jnp.full(out_ref.shape, tile_sum, dtype=out_ref.dtype)

    return kernel


def uda_loss(x, x_h, w, b):
    """UDA consistency loss. x, x_h: (B, C, H, W); w: (D, NCLASS); b: (1, NCLASS)."""
    B = x.shape[0]
    D = math.prod(x.shape[1:])
    nclass = w.shape[-1]

    # Flatten NCHW row-major (matches torch .view). No dtype cast here: the
    # reshape is a layout bitcast and activations stream to the kernel in
    # their native dtype (single HBM pass); bf16 cast happens in-kernel.
    x_flat = x.reshape(B, D)
    xh_flat = x_h.reshape(B, D)
    w_bf = w.astype(jnp.bfloat16)                       # tiny; negligible cast cost
    b_f32 = jnp.reshape(b, (1, nclass)).astype(jnp.float32)

    def _round8(n):
        return ((n + 7) // 8) * 8

    itemsize = jnp.dtype(x_flat.dtype).itemsize
    # Per-batch-row VMEM bytes: 2 inputs x 2 pipeline buffers x itemsize (streamed
    # tiles) + 2 in-kernel bf16 copies x 2 bytes (MXU operands).
    bytes_per_row = D * (4 * itemsize + 4)
    act_budget = 36 * 1024 * 1024          # leaves ample headroom under v7x's 64 MiB VMEM
    tb_cap = max(8, ((act_budget // bytes_per_row) // 8) * 8)
    tb = min(1024, tb_cap, _round8(B))
    # v7x megacore: ensure >= 2 tiles on the "parallel" axis whenever B can split.
    if pl.cdiv(B, tb) < 2 and B > 8:
        tb = max(8, _round8(pl.cdiv(B, 2)))
    num_tiles = pl.cdiv(B, tb)

    grid_spec = pltpu.PrefetchScalarGridSpec(
        num_scalar_prefetch=0,
        grid=(num_tiles,),
        in_specs=[
            pl.BlockSpec((tb, D), lambda i: (i, 0)),       # x tile (pipelined)
            pl.BlockSpec((tb, D), lambda i: (i, 0)),       # x_h tile (pipelined)
            pl.BlockSpec((D, nclass), lambda i: (0, 0)),   # weights (fetched once)
            pl.BlockSpec((1, nclass), lambda i: (0, 0)),   # bias (fetched once)
        ],
        out_specs=pl.BlockSpec((8, 128), lambda i: (i, 0)),
    )

    cost = pl.CostEstimate(
        flops=int(4 * B * D * nclass),
        transcendentals=int(5 * B * nclass),
        bytes_accessed=int(2 * B * D * itemsize + D * nclass * 2
                           + num_tiles * 8 * 128 * 4),
    )

    partial_slab = pl.pallas_call(
        _make_uda_kernel(B, tb),
        out_shape=jax.ShapeDtypeStruct((num_tiles * 8, 128), jnp.float32),
        grid_spec=grid_spec,
        compiler_params=pltpu.CompilerParams(
            dimension_semantics=("parallel",),
            vmem_limit_bytes=48 * 1024 * 1024,
        ),
        cost_estimate=cost,
    )(x_flat, xh_flat, w_bf, b_f32)

    # Each tile broadcast its scalar partial sum over its (8, 128) block; take one
    # element per tile and finish the reduction + divide by the true batchsize.
    partials = partial_slab.reshape(num_tiles, 8 * 128)[:, 0]
    return jnp.sum(partials) / jnp.float32(B)


def uda_loss_ref(x, x_h, w, b):
    """Pure-JAX reference mirroring the kernel's precision (bf16 MXU operands, f32 math)."""
    B = x.shape[0]
    x_flat = x.reshape(B, -1).astype(jnp.bfloat16)
    xh_flat = x_h.reshape(B, -1).astype(jnp.bfloat16)
    w_bf = w.astype(jnp.bfloat16)
    b_f32 = jnp.reshape(b, (1, -1)).astype(jnp.float32)
    logits_x = jnp.dot(x_flat, w_bf, preferred_element_type=jnp.float32) + b_f32
    logits_xh = jnp.dot(xh_flat, w_bf, preferred_element_type=jnp.float32) + b_f32
    p = jax.nn.softmax(logits_x, axis=1)
    log_q = jax.nn.log_softmax(logits_xh, axis=1)
    return jnp.sum(p * (jnp.log(p) - log_q)) / B


if __name__ == "__main__":
    key = jax.random.PRNGKey(0)
    k_x, k_xh, k_w, k_b = jax.random.split(key, 4)

    # Small CIFAR10-like shapes; B=10 deliberately exercises the 2-tile grid
    # (8 + 2 rows) and the in-kernel row masking of the partial last tile.
    B, C, H, W = 10, 3, 16, 16
    NCLASS = 10
    D = C * H * W

    x = jax.random.normal(k_x, (B, C, H, W), dtype=jnp.float32)
    x_h = x + 0.1 * jax.random.normal(k_xh, (B, C, H, W), dtype=jnp.float32)

    # Deterministic linear "model" parameters.
    # TODO(synk): the PyTorch module takes an arbitrary `model`; only a linear
    # classifier head is fused here.
    w = 0.05 * jax.random.normal(k_w, (D, NCLASS), dtype=jnp.float32)
    b = 0.01 * jax.random.normal(k_b, (1, NCLASS), dtype=jnp.float32)

    loss = jax.block_until_ready(uda_loss(x, x_h, w, b))
    loss_ref = jax.block_until_ready(uda_loss_ref(x, x_h, w, b))

    assert jnp.isfinite(loss), "loss is not finite"
    assert jnp.allclose(loss, loss_ref, rtol=3e-3, atol=1e-5), (loss, loss_ref)
    print("KERNEL_OK")
</pallas_src>

<mosaic_0001>
module attributes {stable_mosaic.version = 11 : i64} {
  func.func @kernel(%arg0: i32, %arg1: memref<8x768xf32, #tpu.memory_space<vmem>>, %arg2: memref<8x768xf32, #tpu.memory_space<vmem>>, %arg3: memref<768x10xbf16, #tpu.memory_space<vmem>>, %arg4: memref<1x10xf32, #tpu.memory_space<vmem>>, %arg5: memref<8x128xf32, #tpu.memory_space<vmem>>) attributes {dimension_semantics = [#tpu.dimension_semantics<parallel>], iteration_bounds = array<i64: 2>, scalar_prefetch = 0 : i64, scratch_operands = 0 : i64, tpu.core_type = #tpu.core_type<tc>, window_params = [{transform_indices = @transform_0, window_bounds = array<i64: 8, 768>}, {transform_indices = @transform_1, window_bounds = array<i64: 8, 768>}, {pipeline_mode = #tpu.pipeline_mode<synchronous>, transform_indices = @transform_2, window_bounds = array<i64: 768, 10>}, {pipeline_mode = #tpu.pipeline_mode<synchronous>, transform_indices = @transform_3, window_bounds = array<i64: 1, 10>}, {transform_indices = @transform_4, window_bounds = array<i64: 8, 128>}]} {
    %c0 = arith.constant 0 : index
    %c0_0 = arith.constant 0 : index
    %0 = vector.load %arg3[%c0, %c0_0] : memref<768x10xbf16, #tpu.memory_space<vmem>>, vector<768x10xbf16>
    %c0_1 = arith.constant 0 : index
    %c0_2 = arith.constant 0 : index
    %1 = vector.load %arg4[%c0_1, %c0_2] : memref<1x10xf32, #tpu.memory_space<vmem>>, vector<1x10xf32>
    %c0_3 = arith.constant 0 : index
    %c0_4 = arith.constant 0 : index
    %2 = vector.load %arg1[%c0_3, %c0_4] : memref<8x768xf32, #tpu.memory_space<vmem>>, vector<8x768xf32>
    %3 = arith.truncf %2 : vector<8x768xf32> to vector<8x768xbf16>
    %c0_5 = arith.constant 0 : index
    %c0_6 = arith.constant 0 : index
    %4 = vector.load %arg2[%c0_5, %c0_6] : memref<8x768xf32, #tpu.memory_space<vmem>>, vector<8x768xf32>
    %5 = arith.truncf %4 : vector<8x768xf32> to vector<8x768xbf16>
    %cst = arith.constant dense<0.000000e+00> : vector<8x10xf32>
    %6 = tpu.matmul %3, %0, %cst {dimension_numbers = #tpu.dot_dimension_numbers<[1], [0], [0], [1], [0, 0, 1, 1], [], []>} : vector<8x768xbf16>, vector<768x10xbf16>, vector<8x10xf32> -> vector<8x10xf32>
    %7 = vector.broadcast %1 : vector<1x10xf32> to vector<8x10xf32>
    %8 = arith.addf %6, %7 : vector<8x10xf32>
    %cst_7 = arith.constant dense<0.000000e+00> : vector<8x10xf32>
    %9 = tpu.matmul %5, %0, %cst_7 {dimension_numbers = #tpu.dot_dimension_numbers<[1], [0], [0], [1], [0, 0, 1, 1], [], []>} : vector<8x768xbf16>, vector<768x10xbf16>, vector<8x10xf32> -> vector<8x10xf32>
    %10 = vector.broadcast %1 : vector<1x10xf32> to vector<8x10xf32>
    %11 = arith.addf %9, %10 : vector<8x10xf32>
    %12 = tpu.iota {dimensions = array<i32: 0>} : vector<8x1xi32>
    %c8_i32 = arith.constant 8 : i32
    %13 = arith.muli %arg0, %c8_i32 : i32
    %14 = vector.broadcast %13 : i32 to vector<8x1xi32>
    %15 = arith.addi %14, %12 : vector<8x1xi32>
    %c10_i32 = arith.constant 10 : i32
    %16 = vector.broadcast %c10_i32 : i32 to vector<8x1xi32>
    %17 = arith.cmpi slt, %15, %16 : vector<8x1xi32>
    %cst_8 = arith.constant 0.000000e+00 : f32
    %18 = vector.shape_cast %17 : vector<8x1xi1> to vector<8x1xi1>
    %19 = vector.broadcast %18 : vector<8x1xi1> to vector<8x10xi1>
    %20 = vector.broadcast %cst_8 : f32 to vector<8x10xf32>
    %21 = arith.select %19, %8, %20 : vector<8x10xi1>, vector<8x10xf32>
    %cst_9 = arith.constant 0.000000e+00 : f32
    %22 = vector.shape_cast %17 : vector<8x1xi1> to vector<8x1xi1>
    %23 = vector.broadcast %22 : vector<8x1xi1> to vector<8x10xi1>
    %24 = vector.broadcast %cst_9 : f32 to vector<8x10xf32>
    %25 = arith.select %23, %11, %24 : vector<8x10xi1>, vector<8x10xf32>
    %cst_10 = arith.constant dense<0xFF800000> : vector<8xf32>
    %26 = vector.multi_reduction <maximumf>, %21, %cst_10 [1] : vector<8x10xf32> to vector<8xf32>
    %27 = vector.shape_cast %26 : vector<8xf32> to vector<8x1xf32>
    %28 = vector.broadcast %27 : vector<8x1xf32> to vector<8x10xf32>
    %29 = arith.subf %21, %28 : vector<8x10xf32>
    %30 = math.exp %29 : vector<8x10xf32>
    %cst_11 = arith.constant dense<0.000000e+00> : vector<8xf32>
    %31 = vector.multi_reduction <add>, %30, %cst_11 [1] : vector<8x10xf32> to vector<8xf32>
    %32 = vector.shape_cast %31 : vector<8xf32> to vector<8x1xf32>
    %33 = vector.broadcast %32 : vector<8x1xf32> to vector<8x10xf32>
    %34 = arith.divf %30, %33 : vector<8x10xf32>
    %35 = math.log %32 : vector<8x1xf32>
    %36 = vector.broadcast %35 : vector<8x1xf32> to vector<8x10xf32>
    %37 = arith.subf %29, %36 : vector<8x10xf32>
    %cst_12 = arith.constant dense<0xFF800000> : vector<8xf32>
    %38 = vector.multi_reduction <maximumf>, %25, %cst_12 [1] : vector<8x10xf32> to vector<8xf32>
    %39 = vector.shape_cast %38 : vector<8xf32> to vector<8x1xf32>
    %40 = vector.broadcast %39 : vector<8x1xf32> to vector<8x10xf32>
    %41 = arith.subf %25, %40 : vector<8x10xf32>
    %42 = math.exp %41 : vector<8x10xf32>
    %cst_13 = arith.constant dense<0.000000e+00> : vector<8xf32>
    %43 = vector.multi_reduction <add>, %42, %cst_13 [1] : vector<8x10xf32> to vector<8xf32>
    %44 = vector.shape_cast %43 : vector<8xf32> to vector<8x1xf32>
    %45 = math.log %44 : vector<8x1xf32>
    %46 = vector.broadcast %45 : vector<8x1xf32> to vector<8x10xf32>
    %47 = arith.subf %41, %46 : vector<8x10xf32>
    %48 = arith.subf %37, %47 : vector<8x10xf32>
    %49 = arith.mulf %34, %48 : vector<8x10xf32>
    %cst_14 = arith.constant dense<0.000000e+00> : vector<8xf32>
    %50 = vector.multi_reduction <add>, %49, %cst_14 [1] : vector<8x10xf32> to vector<8xf32>
    %51 = vector.shape_cast %50 : vector<8xf32> to vector<8x1xf32>
    %cst_15 = arith.constant 0.000000e+00 : f32
    %52 = vector.broadcast %cst_15 : f32 to vector<8x1xf32>
    %53 = arith.select %17, %51, %52 : vector<8x1xi1>, vector<8x1xf32>
    %54 = vector.shape_cast %53 : vector<8x1xf32> to vector<1x8x1xf32>
    %cst_16 = arith.constant dense<0.000000e+00> : vector<1xf32>
    %55 = vector.multi_reduction <add>, %54, %cst_16 [1, 2] : vector<1x8x1xf32> to vector<1xf32>
    %56 = vector.shape_cast %55 : vector<1xf32> to vector<1x1x1xf32>
    %57 = vector.extract %56[0, 0, 0] : f32 from vector<1x1x1xf32>
    %58 = vector.broadcast %57 : f32 to vector<8x128xf32>
    %c0_17 = arith.constant 0 : index
    %c0_18 = arith.constant 0 : index
    %59 = vector.load %arg5[%c0_17, %c0_18] : memref<8x128xf32, #tpu.memory_space<vmem>>, vector<8x128xf32>
    tpu.vector_store %arg5[%c0_17, %c0_18], %58 {strides = array<i32>} : memref<8x128xf32, #tpu.memory_space<vmem>>, vector<8x128xf32>,
    return
  }
  func.func @transform_0(%arg0: i32) -> (i32, i32) {
    %c0_i32 = arith.constant 0 : i32
    %c0_i32_0 = arith.constant 0 : i32
    return %arg0, %c0_i32 : i32, i32
  }
  func.func @transform_1(%arg0: i32) -> (i32, i32) {
    %c0_i32 = arith.constant 0 : i32
    %c0_i32_0 = arith.constant 0 : i32
    return %arg0, %c0_i32 : i32, i32
  }
  func.func @transform_2(%arg0: i32) -> (i32, i32) {
    %c0_i32 = arith.constant 0 : i32
    %c0_i32_0 = arith.constant 0 : i32
    %c0_i32_1 = arith.constant 0 : i32
    return %c0_i32, %c0_i32_0 : i32, i32
  }
  func.func @transform_3(%arg0: i32) -> (i32, i32) {
    %c0_i32 = arith.constant 0 : i32
    %c0_i32_0 = arith.constant 0 : i32
    %c0_i32_1 = arith.constant 0 : i32
    return %c0_i32, %c0_i32_0 : i32, i32
  }
  func.func @transform_4(%arg0: i32) -> (i32, i32) {
    %c0_i32 = arith.constant 0 : i32
    %c0_i32_0 = arith.constant 0 : i32
    return %arg0, %c0_i32 : i32, i32
  }
}

</mosaic_0001>

<bundles_post_ra>
// kernel: tpu_custom_call.1
= control target key start
LH: loop header
LB: loop body
LE: loop exit
PB: predicated region body
PF: predicated region fallthrough
CT: control target
= control target key end

     0   :  { %9 = vsyncpa [#allocation3], 0  ;;  %s1823_s0 = inlined_call_operand.vmem [shape: f32[10,768], index: 0, kind: input, shape index: {}]   ;;  %s1824_s1 = inlined_call_operand.vmem [shape: f32[10,768], index: 1, kind: input, shape index: {}]   ;;  %s1825_s2 = inlined_call_operand.vmem [shape: bf16[768,10], index: 2, kind: input, shape index: {}]   ;;  %s1826_s3 = inlined_call_operand.vmem [shape: f32[1,10], index: 3, kind: input, shape index: {}]   ;;  %s1827_s4 = inlined_call_operand.hbm [shape: f32[16,128], index: 4, kind: output, shape index: {}]  }
   0x1   :  { %11 = vsyncpa [#allocation3 + $0x1], 0  ;;  %s1394_s15 = smov 0   ;;  %s1396_s16 = smov 0  }
   0x2   :  { %s1398_s17 = smov 0   ;;  %s1400_s18 = smov 0  }
   0x3 LB: > { %s1415_s19 = sadd.s32 4294967295, %s1366_s18   ;;  %s1013_s20 = sadd.s32 4294967294, %s1366_s18   ;;  %s1366_s18 = sphi %s1400_s18, %s1833_s18   ;;  %s1362_s17 = sphi %s1398_s17, %s1832_s17   ;;  %s1358_s16 = sphi %s1396_s16, %s1831_s16   ;;  %s1354_s15 = sphi %s1394_s15, %s1830_s15  }
   0x4   : > { %s1419_s21 = sadd.s32 1, %s1366_s18   ;;  %s118_s22 = sadd.s32 1, %s1362_s17 }
   0x5   : > { %s115_s23 = ssub.s32 %s1366_s18, %s1419_s21  ;;  %p128_p0 = scmp.ne.s32.totalorder %s1362_s17, %s1358_s16 }
   0x6   : > { %p116_p1 = scmp.eq.s32.totalorder %s115_s23, 0  ;;  %p129_p2 = scmp.eq.s32.totalorder %s1415_s19, 1 }
   0x7   : > { %p134_p3 = scmp.ne.s32.totalorder %s1358_s16, %s1354_s15  ;;  %p135_p4 = scmp.eq.s32.totalorder %s1013_s20, 1 }
   0x8   : > { %s1430_s24 = scalar_select %p116_p1, %s1362_s17, %s118_s22  }
   0x9   : > { %p1432_p5 = por %p129_p2, %p128_p0  ;;  %p1436_p6 = por %p135_p4, %p134_p3 }
   0xa   : > { %p1016_p7 = scmp.ge.s32.totalorder %s1366_s18, 1  ;;  %p175_p8 = scmp.lt.s32.totalorder %s1366_s18, 3 }
   0xc   : > { %p176_p9 = pnand %p1016_p7, %p175_p8 }
   0xd   : > { %p206_p10 = scmp.lt.s32.totalorder (!%p176_p9), %s1415_s19, 1  ;;  %s203_s12 = sand.u32 (!%p176_p9), 1, %s1358_s16  }
   0xe   : > { %179 = sbr.rel (%p176_p9) target bundleno = 992 (0x3e0), region = 36  ;;  %s1071_s14 = sshll.u32 (!%p176_p9), %s1415_s19, 7 }
   0xf   : > { %s940_s28 = scalar_lea.hbm (!%p176_p9), %s1827_s4, %s1071_s14  ;;  %s929_s30 = scalar_lea.sflag (!%p176_p9), [#allocation3], %s203_s12 }
  0x10   : > { %s1368_s6 = smov (!%p176_p9), [#allocation2]  }
  0x13   : > { %v1445_v0 = vld [vmem:[%s1825_s2 + $0x78] sm:$0xff]   ;;  %v1468_v4 = vld [vmem:[%s1825_s2 + $0x70] sm:$0xff]   ;;  %v1492_v8 = vld [vmem:[%s1825_s2 + $0x68] sm:$0xff]   ;;  %s1574_s11 = scalar_select %p206_p10, %s1415_s19, 1  ;;  %vm882_vm1 = vcmask 80896   ;;  %vm915_vm2 = vcmask 7168  }
  0x14   : > { %v1450_v1 = vld [vmem:[%s1825_s2 + $0xf8] sm:$0xff]   ;;  %1074 = vmatprep.subr.bf16.mxu0 %v1445_v0  ;;  %v1474_v5 = vld [vmem:[%s1825_s2 + $0xf0] sm:$0xff]   ;;  %v1498_v9 = vld [vmem:[%s1825_s2 + $0xe8] sm:$0xff]  }
  0x15   : > { %v1456_v2 = vld [vmem:[%s1825_s2 + $0x38] sm:$0xff]   ;;  %1096 = vmatprep.subr.bf16.mxu1 %v1450_v1  ;;  %v1480_v6 = vld [vmem:[%s1825_s2 + $0x30] sm:$0xff]   ;;  %v1504_v10 = vld [vmem:[%s1825_s2 + $0x28] sm:$0xff]   ;;  %s1206_s29 = smul.u32 48, %s1574_s11  ;;  %s1017_s11 = sshll.u32 %s203_s12, 3 }
  0x16   : > { %v1462_v3 = vld [vmem:[%s1825_s2 + $0xb8] sm:$0xff]   ;;  %1075 = vmatpush3.bf16.msra.mxu0 %v1456_v2  ;;  %v1486_v7 = vld [vmem:[%s1825_s2 + $0xb0] sm:$0xff]   ;;  %v1510_v11 = vld [vmem:[%s1825_s2 + $0xa8] sm:$0xff]  }
  0x17   : > { %1097 = vmatpush3.bf16.msra.mxu1 %v1462_v3  ;;  %1076 = vmatprep.subr.bf16.mxu0 %v1468_v4  ;;  %v1516_v12 = vld [vmem:[%s1825_s2 + $0x60] sm:$0xff]   ;;  %v1540_v16 = vld [vmem:[%s1825_s2 + $0x58] sm:$0xff]   ;;  %v1565_v20 = vld [vmem:[%s1825_s2 + $0x50] sm:$0xff]   ;;  %s1630_s20 = scalar_lea.vmem %s1823_s0, %s1206_s29  ;;  %s1701_s8 = scalar_lea.vmem %s1824_s1, %s1206_s29 }
  0x18   : > { %1098 = vmatprep.subr.bf16.mxu1 %v1474_v5  ;;  %v1522_v13 = vld [vmem:[%s1825_s2 + $0xe0] sm:$0xff]   ;;  %v1546_v17 = vld [vmem:[%s1825_s2 + $0xd8] sm:$0xff]   ;;  %v1571_v21 = vld [vmem:[%s1825_s2 + $0xd0] sm:$0xff]   ;;  %s205_s29 = scalar_lea.vmem [#allocation2], %s1017_s11 }
  0x19   : > { %v1528_v14 = vld [vmem:[%s1825_s2 + $0x20] sm:$0xff]   ;;  %v1553_v18 = vld [vmem:[%s1825_s2 + $0x18] sm:$0xff]   ;;  %v1580_v22 = vld [vmem:[%s1825_s2 + $0x10] sm:$0xff]   ;;  %s942_s13 = sshll.u32 %s205_s29, 4  ;;  %s1785_s13 = int_to_ptr.vmem [resolvable:$true] %s942_s13 }
  0x1a   : > { %1077 = vmatpush3.bf16.msra.mxu0 %v1480_v6  ;;  %v1534_v15 = vld [vmem:[%s1825_s2 + $0xa0] sm:$0xff]   ;;  %v1559_v19 = vld [vmem:[%s1825_s2 + $0x98] sm:$0xff]   ;;  %v1586_v23 = vld [vmem:[%s1825_s2 + $0x90] sm:$0xff]   ;;  %s1306_s5 = scalar_lea.vmem %s1785_s13, 128 }
  0x1b   : > { %1099 = vmatpush3.bf16.msra.mxu1 %v1486_v7  ;;  %1078 = vmatprep.subr.bf16.mxu0 %v1492_v8  ;;  %v1592_v24 = vld [vmem:[%s1825_s2 + $0x48] sm:$0xff]   ;;  %v1617_v28 = vld [vmem:[%s1825_s2 + $0x40] sm:$0xff]   ;;  %v317_v33 = vld [vmem:[%s1630_s20 + $0x18] sm:$0xff]  ;;  %p1307_p11 = scmp.ne.s32.totalorder %s1785_s13, %s1306_s5 }
  0x1c   : > { %1100 = vmatprep.subr.bf16.mxu1 %v1498_v9  ;;  %v1598_v25 = vld [vmem:[%s1825_s2 + $0xc8] sm:$0xff]   ;;  %v1623_v29 = vld [vmem:[%s1825_s2 + $0xc0] sm:$0xff]   ;;  %v323_v36 = vpack.c.bf16 %v317_v33, %v317_v33  ;;  %v316_v38 = vld [vmem:[%s1630_s20 + $0x10] sm:$0xff] }
  0x1d   : > { %v1605_v26 = vld [vmem:[%s1825_s2 + $0x8] sm:$0xff]   ;;  %v1636_v30 = vld [vmem:[%s1825_s2] sm:$0xff]   ;;  %v322_v39 = vpack.c.bf16 %v316_v38, %v316_v38  ;;  %v1653_v40 = vld [vmem:[%s1825_s2 + $0x178] sm:$0xff]   ;;  %p1308_p12 = pnand %p1307_p11, %p1432_p5 }
  0x1e   : > { %1079 = vmatpush3.bf16.msra.mxu0 %v1504_v10  ;;  %v1611_v27 = vld [vmem:[%s1825_s2 + $0x88] sm:$0xff]   ;;  %v1642_v31 = vld [vmem:[%s1825_s2 + $0x80] sm:$0xff]   ;;  %704 = vmatprep.mubr.bf16.mxu1 %v323_v36  ;;  %v1659_v41 = vld [vmem:[%s1825_s2 + $0x138] sm:$0xff]  }
  0x1f   : > { %1101 = vmatpush3.bf16.msra.mxu1 %v1510_v11  ;;  %1080 = vmatprep.subr.bf16.mxu0 %v1516_v12  ;;  %v315_v32 = vld [vmem:[%s1630_s20 + $0x8] sm:$0xff]  ;;  %v314_v34 = vld [vmem:[%s1630_s20] sm:$0xff]  ;;  %v1664_v42 = vld [vmem:[%s1825_s2 + $0x170] sm:$0xff]   ;;  %p1309_p13 = pneg %p1308_p12 }
  0x20   : > { %1102 = vmatprep.subr.bf16.mxu1 %v1522_v13  ;;  %v321_v35 = vpack.c.bf16 %v315_v32, %v315_v32  ;;  %v320_v37 = vpack.c.bf16 %v314_v34, %v314_v34  ;;  %v1673_v43 = vld [vmem:[%s1825_s2 + $0x130] sm:$0xff]   ;;  %v1679_v44 = vld [vmem:[%s1825_s2 + $0x168] sm:$0xff]   ;;  %v1286_v46 = vld [vmem:[%s1825_s2 + $0x160] sm:$0xff]  }
  0x21   : > { %v1285_v45 = vld [vmem:[%s1825_s2 + $0x128] sm:$0xff]   ;;  %v1287_v47 = vld [vmem:[%s1825_s2 + $0x120] sm:$0xff]   ;;  %v1288_v48 = vld [vmem:[%s1825_s2 + $0x158] sm:$0xff]  }
  0x22   : > { %1081 = vmatpush3.bf16.msra.mxu0 %v1528_v14  ;;  %664 = vmatprep.mubr.bf16.mxu0 %v321_v35  ;;  %v319_v49 = vld [vmem:[%s1630_s20 + $0x28] sm:$0xff]  ;;  %v1289_v51 = vld [vmem:[%s1825_s2 + $0x118] sm:$0xff]   ;;  %v1290_v54 = vld [vmem:[%s1825_s2 + $0x150] sm:$0xff]  }
  0x23   : > { %1103 = vmatpush3.bf16.msra.mxu1 %v1534_v15  ;;  %1082 = vmatprep.subr.bf16.mxu0 %v1540_v16  ;;  %v327_v50 = vld [vmem:[%s1701_s8 + $0x8] sm:$0xff]  ;;  %v325_v52 = vpack.c.bf16 %v319_v49, %v319_v49  ;;  %v1291_v55 = vld [vmem:[%s1825_s2 + $0x110] sm:$0xff]   ;;  %v1294_v58 = vld [vmem:[%s1825_s2 + $0x140] sm:$0xff]  }
  0x24   : > { %1104 = vmatprep.subr.bf16.mxu1 %v1546_v17  ;;  %v333_v53 = vpack.c.bf16 %v327_v50, %v327_v50  ;;  %v1292_v56 = vld [vmem:[%s1825_s2 + $0x148] sm:$0xff]   ;;  %v326_v59 = vld [vmem:[%s1701_s8] sm:$0xff]  ;;  %v329_v63 = vld [vmem:[%s1701_s8 + $0x18] sm:$0xff] }
  0x25   : > { %v1293_v57 = vld [vmem:[%s1825_s2 + $0x108] sm:$0xff]   ;;  %v1295_v60 = vld [vmem:[%s1825_s2 + $0x100] sm:$0xff]   ;;  %v332_v62 = vpack.c.bf16 %v326_v59, %v326_v59 }
  0x26   : > { %1083 = vmatpush3.bf16.msra.mxu0 %v1553_v18  ;;  %v318_v61 = vld [vmem:[%s1630_s20 + $0x20] sm:$0xff]  ;;  %s1069_s20 = sshll.u32 %s1415_s19, 3  ;;  %s1310_s19 = sshll.u32 %s1368_s6, 4  ;;  %s1311_s19 = int_to_ptr.vmem [resolvable:$false] %s1310_s19 }
  0x27   : > { %1105 = vmatpush3.bf16.msra.mxu1 %v1559_v19  ;;  %1084 = vmatprep.subr.bf16.mxu0 %v1565_v20  ;;  %s1312_s7 = scalar_lea.vmem %s1311_s19, 256  ;;  %p1313_p0 = scmp.lt.s32.totalorder %s1785_s13, %s1311_s19 }
  0x28   : > { %1106 = vmatprep.subr.bf16.mxu1 %v1571_v21  ;;  %p1314_p1 = scmp.lt.s32.totalorder %s1312_s7, %s1306_s5 }
  0x2a   : > { %1085 = vmatpush3.bf16.msra.mxu0 %v1580_v22  ;;  %p1315_p2 = por %p1314_p1, %p1313_p0 }
  0x2b   : > { %1107 = vmatpush3.bf16.msra.mxu1 %v1586_v23  ;;  %1086 = vmatprep.subr.bf16.mxu0 %v1592_v24 }
  0x2c   : > { %1108 = vmatprep.subr.bf16.mxu1 %v1598_v25  ;;  %p1316_p3 = pnand %p1315_p2, %p1309_p13 }
  0x2e   : > { %1087 = vmatpush3.bf16.msra.mxu0 %v1605_v26 }
  0x2f   : > { %1109 = vmatpush3.bf16.msra.mxu1 %v1611_v27  ;;  %1088 = vmatprep.subr.bf16.mxu0 %v1617_v28 }
  0x30   : > { %1110 = vmatprep.subr.bf16.mxu1 %v1623_v29 }
  0x32   : > { %1089 = vmatpush3.bf16.msra.mxu0 %v1636_v30 }
  0x33   : > { %1111 = vmatpush3.bf16.msra.mxu1 %v1642_v31  ;;  %1118 = vmatprep.subr.bf16.mxu0 %v1653_v40 }
  0x34   : > { %1140 = vmatprep.subr.bf16.mxu1 %v1445_v0  ;;  %v324_v0 = vpack.c.bf16 %v318_v61, %v318_v61 }
  0x35   : > { %665 = vmatmul.mubr.bf16.vlgmr.msra.gmra.mxu0 %v320_v37 }
  0x36   : > { %705 = vmatmul.mubr.bf16.vlgmr.msra.gmra.mxu1 %v322_v39  ;;  %1119 = vmatpush3.bf16.msra.mxu0 %v1659_v41 }
  0x37   : > { %1141 = vmatpush3.bf16.msra.mxu1 %v1456_v2  ;;  %1120 = vmatprep.subr.bf16.mxu0 %v1664_v42  ;;  %v331_v2 = vld [vmem:[%s1701_s8 + $0x28] sm:$0xff] }
  0x38   : > { %1142 = vmatprep.subr.bf16.mxu1 %v1468_v4  ;;  %744 = vmatprep.mubr.bf16.mxu0 %v325_v52  ;;  %v335_v4 = vpack.c.bf16 %v329_v63, %v329_v63 }
  0x39   : > { %784 = vmatprep.mubr.bf16.mxu1 %v333_v53 }
  0x3a   : > { %1121 = vmatpush3.bf16.msra.mxu0 %v1673_v43 }
  0x3b   : > { %1143 = vmatpush3.bf16.msra.mxu1 %v1480_v6  ;;  %1122 = vmatprep.subr.bf16.mxu0 %v1679_v44  ;;  %v337_v6 = vpack.c.bf16 %v331_v2, %v331_v2 }
  0x3c   : > { %1144 = vmatprep.subr.bf16.mxu1 %v1492_v8 }
  0x3e   : > { %1123 = vmatpush3.bf16.msra.mxu0 %v1285_v45 }
  0x3f   : > { %1145 = vmatpush3.bf16.msra.mxu1 %v1504_v10  ;;  %1124 = vmatprep.subr.bf16.mxu0 %v1286_v46 }
  0x40   : > { %1146 = vmatprep.subr.bf16.mxu1 %v1516_v12 }
  0x42   : > { %1125 = vmatpush3.bf16.msra.mxu0 %v1287_v47 }
  0x43   : > { %1147 = vmatpush3.bf16.msra.mxu1 %v1528_v14  ;;  %1126 = vmatprep.subr.bf16.mxu0 %v1288_v48 }
  0x44   : > { %1148 = vmatprep.subr.bf16.mxu1 %v1540_v16  ;;  %v872_v16 = vlaneseq }
  0x46   : > { %1127 = vmatpush3.bf16.msra.mxu0 %v1289_v51 }
  0x47   : > { %1149 = vmatpush3.bf16.msra.mxu1 %v1553_v18  ;;  %1128 = vmatprep.subr.bf16.mxu0 %v1290_v54  ;;  %v1020_v18 = vld [vmem:[%s1826_s3] ss:$0 sm:$0xff] }
  0x48   : > { %1150 = vmatprep.subr.bf16.mxu1 %v1565_v20  ;;  %v875_v20 = vstv %s1069_s20 }
  0x4a   : > { %1129 = vmatpush3.bf16.msra.mxu0 %v1291_v55 }
  0x4b   : > { %1151 = vmatpush3.bf16.msra.mxu1 %v1580_v22  ;;  %1130 = vmatprep.subr.bf16.mxu0 %v1292_v56 }
  0x4c   : > { %1152 = vmatprep.subr.bf16.mxu1 %v1592_v24 }
  0x4e   : > { %1131 = vmatpush3.bf16.msra.mxu0 %v1293_v57 }
  0x4f   : > { %1153 = vmatpush3.bf16.msra.mxu1 %v1605_v26  ;;  %1132 = vmatprep.subr.bf16.mxu0 %v1294_v58 }
  0x50   : > { %1154 = vmatprep.subr.bf16.mxu1 %v1617_v28 }
  0x52   : > { %1133 = vmatpush3.bf16.msra.mxu0 %v1295_v60 }
  0x53   : > { %1155 = vmatpush3.bf16.msra.mxu1 %v1636_v30  ;;  %1162 = vmatprep.subr.bf16.mxu0 %v1450_v1  ;;  %v330_v1 = vld [vmem:[%s1701_s8 + $0x20] sm:$0xff] }
  0x54   : > { %1184 = vmatprep.subr.bf16.mxu1 %v1653_v40 }
  0x55   : > { %745 = vmatmul.mubr.bf16.vlgmr.msra.gmra.mxu0 %v324_v0 }
  0x56   : > { %785 = vmatmul.mubr.bf16.vlgmr.msra.gmra.mxu1 %v332_v62  ;;  %1163 = vmatpush3.bf16.msra.mxu0 %v1462_v3  ;;  %v328_v3 = vld [vmem:[%s1701_s8 + $0x10] sm:$0xff] }
  0x57   : > { %1185 = vmatpush3.bf16.msra.mxu1 %v1659_v41  ;;  %1164 = vmatprep.subr.bf16.mxu0 %v1474_v5  ;;  %v336_v5 = vpack.c.bf16 %v330_v1, %v330_v1 }
  0x58   : > { %1186 = vmatprep.subr.bf16.mxu1 %v1664_v42  ;;  %824 = vmatprep.mubr.bf16.mxu0 %v335_v4 }
  0x59   : > { %864 = vmatprep.mubr.bf16.mxu1 %v337_v6 }
  0x5a   : > { %1165 = vmatpush3.bf16.msra.mxu0 %v1486_v7  ;;  %v334_v7 = vpack.c.bf16 %v328_v3, %v328_v3 }
  0x5b   : > { %1187 = vmatpush3.bf16.msra.mxu1 %v1673_v43  ;;  %1166 = vmatprep.subr.bf16.mxu0 %v1498_v9 }
  0x5c   : > { %1188 = vmatprep.subr.bf16.mxu1 %v1679_v44 }
  0x5e   : > { %1167 = vmatpush3.bf16.msra.mxu0 %v1510_v11 }
  0x5f   : > { %1189 = vmatpush3.bf16.msra.mxu1 %v1285_v45  ;;  %1168 = vmatprep.subr.bf16.mxu0 %v1522_v13 }
  0x60   : > { %1190 = vmatprep.subr.bf16.mxu1 %v1286_v46 }
  0x62   : > { %1169 = vmatpush3.bf16.msra.mxu0 %v1534_v15 }
  0x63   : > { %1191 = vmatpush3.bf16.msra.mxu1 %v1287_v47  ;;  %1170 = vmatprep.subr.bf16.mxu0 %v1546_v17 }
  0x64   : > { %1192 = vmatprep.subr.bf16.mxu1 %v1288_v48 }
  0x66   : > { %1171 = vmatpush3.bf16.msra.mxu0 %v1559_v19  ;;  %v873_v19 = vshrl.u32 %v872_v16, 7 }
  0x67   : > { %1193 = vmatpush3.bf16.msra.mxu1 %v1289_v51  ;;  %1172 = vmatprep.subr.bf16.mxu0 %v1571_v21 }
  0x68   : > { %1194 = vmatprep.subr.bf16.mxu1 %v1290_v54 }
  0x6a   : > { %1173 = vmatpush3.bf16.msra.mxu0 %v1586_v23 }
  0x6b   : > { %1195 = vmatpush3.bf16.msra.mxu1 %v1291_v55  ;;  %1174 = vmatprep.subr.bf16.mxu0 %v1598_v25  ;;  %v1769_v25 = vadd.s32 %v875_v20, %v873_v19 }
  0x6c   : > { %1196 = vmatprep.subr.bf16.mxu1 %v1292_v56 }
  0x6d   : > { %vm877_vm0 = vcmp.lt.s32.totalorder %v1769_v25, 10 }
  0x6e   : > { %1175 = vmatpush3.bf16.msra.mxu0 %v1611_v27 }
  0x6f   : > { %1197 = vmatpush3.bf16.msra.mxu1 %v1293_v57  ;;  %1176 = vmatprep.subr.bf16.mxu0 %v1623_v29 }
  0x70   : > { %1198 = vmatprep.subr.bf16.mxu1 %v1294_v58 }
  0x72   : > { %1177 = vmatpush3.bf16.msra.mxu0 %v1642_v31 }
  0x73   : > { %1199 = vmatpush3.bf16.msra.mxu1 %v1295_v60 }
  0x75   : > { %825 = vmatmul.mubr.bf16.vlgmr.msra.gmra.mxu0 %v334_v7 }
  0x76   : > { %865 = vmatmul.mubr.bf16.vlgmr.msra.gmra.mxu1 %v336_v5 }
  0xf5   : > { %v1090_v8 = vpop.f32.mrf.mxu0 }
  0xf6   : > { %v1112_v9 = vpop.f32.mrf.mxu1 }
  0xf7   : > { %v1091_v10 = vpop.f32.mrf.mxu0 }
  0xf8   : > { %v1113_v11 = vpop.f32.mrf.mxu1  ;;  %v1092_v17 = vadd.f32 %v1091_v10, %v1090_v8 }
  0xf9   : > { %v1093_v12 = vpop.f32.mrf.mxu0  ;;  %v1114_v22 = vadd.f32 %v1113_v11, %v1112_v9 }
  0xfa   : > { %v1115_v13 = vpop.f32.mrf.mxu1  ;;  %v667_v21 = vadd.f32 %v1092_v17, %v1020_v18 }
  0xfb   : > { %v1094_v14 = vpop.f32.mrf.mxu0 }
  0xfc   : > { %v1116_v15 = vpop.f32.mrf.mxu1  ;;  %v707_v28 = vadd.f32 %v1114_v22, %v667_v21 }
 0x115   : > { %v1134_v24 = vpop.f32.mrf.mxu0 }
 0x116   : > { %v1156_v23 = vpop.f32.mrf.mxu1 }
 0x117   : > { %v1135_v27 = vpop.f32.mrf.mxu0 }
 0x118   : > { %v1157_v26 = vpop.f32.mrf.mxu1  ;;  %v1136_v29 = vadd.f32 %v1135_v27, %v1134_v24 }
 0x119   : > { %v1137_v31 = vpop.f32.mrf.mxu0  ;;  %v1158_v37 = vadd.f32 %v1157_v26, %v1156_v23 }
 0x11a   : > { %v1159_v30 = vpop.f32.mrf.mxu1  ;;  %v747_v32 = vadd.f32 %v1136_v29, %v707_v28 }
 0x11b   : > { %v1138_v34 = vpop.f32.mrf.mxu0  ;;  %v787_v42 = vadd.f32 %v1158_v37, %v1020_v18 }
 0x11c   : > { %v1160_v33 = vpop.f32.mrf.mxu1  ;;  %v880_v35 = vsel %vm877_vm0, %v747_v32, 0.0 }
 0x11d   : > { %v883_v36 = vsel %vm882_vm1, %v880_v35, -inf }
 0x11e   : > { %884 = vmax.xlane.f32.xlu0 %v883_v36 }
 0x135   : > { %v1178_v39 = vpop.f32.mrf.mxu0 }
 0x136   : > { %v1200_v38 = vpop.f32.mrf.mxu1 }
 0x137   : > { %v1179_v41 = vpop.f32.mrf.mxu0 }
 0x138   : > { %v1201_v40 = vpop.f32.mrf.mxu1  ;;  %v1180_v43 = vadd.f32 %v1179_v41, %v1178_v39 }
 0x139   : > { %v1181_v45 = vpop.f32.mrf.mxu0  ;;  %v1202_v47 = vadd.f32 %v1201_v40, %v1200_v38 }
 0x13a   : > { %v1203_v44 = vpop.f32.mrf.mxu1  ;;  %v827_v46 = vadd.f32 %v1180_v43, %v787_v42 }
 0x13b   : > { %v1182_v49 = vpop.f32.mrf.mxu0 }
 0x13c   : > { %v1204_v48 = vpop.f32.mrf.mxu1  ;;  %v867_v50 = vadd.f32 %v1202_v47, %v827_v46 }
 0x13e   : > { %v881_v51 = vsel %vm877_vm0, %v867_v50, 0.0 }
 0x13f   : > { %v897_v52 = vsel %vm882_vm1, %v881_v51, -inf }
 0x140   : > { %898 = vmax.xlane.f32.xlu0 %v897_v52 }
 0x1a7   : > { %v885_v53 = vpop.xlane.xlu0 %884 }
 0x1a8   : > { %v886_v54 = vsub.f32 %v880_v35, %v885_v53 }
 0x1aa   : > { %v887_v55 = vmul.f32 1.442695, %v886_v54 }
 0x1ac   : > { %1296 = vpow2.f32 %v887_v55 }
 0x1b9   : > { %v1297_v56 = vpop.eup %1296 }
 0x1ba   : > { %v889_v57 = vsel %vm882_vm1, %v1297_v56, 0.0 }
 0x1bb   : > { %890 = vadd.xlane.f32.xlu1 %v889_v57 }
 0x1c9   : > { %v899_v58 = vpop.xlane.xlu0 %898 }
 0x1ca   : > { %v900_v59 = vsub.f32 %v881_v51, %v899_v58 }
 0x1cc   : > { %v901_v60 = vmul.f32 1.442695, %v900_v59 }
 0x1ce   : > { %1298 = vpow2.f32 %v901_v60 }
 0x1db   : > { %v1299_v61 = vpop.eup %1298 }
 0x1dc   : > { %v903_v62 = vsel %vm882_vm1, %v1299_v61, 0.0 }
 0x1dd   : > { %904 = vadd.xlane.f32.xlu1 %v903_v62 }
 0x244   : > { %v891_v63 = vpop.xlane.xlu1 %890 }
 0x245   : > { %1300 = vlog2.f32 %v891_v63 }
 0x252   : > { %v1301_v2 = vpop.eup %1300 }
 0x253   : > { %v895_v4 = vmul.f32 0.6931472, %v1301_v2 }
 0x255   : > { %v896_v7 = vsub.f32 %v886_v54, %v895_v4 }
 0x266   : > { %v905_v0 = vpop.xlane.xlu1 %904 }
 0x267   : > { %1302 = vlog2.f32 %v905_v0 }
 0x268   : > { %1304 = vrcp.f32 %v891_v63 }
 0x274   : > { %v1303_v6 = vpop.eup %1302 }
 0x275   : > { %v907_v1 = vmul.f32 0.6931472, %v1303_v6  ;;  %v1305_v3 = vpop.eup %1304 }
 0x276   : > { %v893_v8 = vmul.f32 %v1305_v3, %v1297_v56 }
 0x277   : > { %v908_v5 = vsub.f32 %v900_v59, %v907_v1 }
 0x279   : > { %v909_v9 = vsub.f32 %v896_v7, %v908_v5 }
 0x27b   : > { %v910_v10 = vmul.f32 %v909_v9, %v893_v8 }
 0x27d   : > { %v911_v11 = vsel %vm882_vm1, %v910_v10, 0.0 }
 0x27e   : > { %912 = vadd.xlane.f32.xlu0 %v911_v11 }
 0x307   : > { %v913_v12 = vpop.xlane.xlu0 %912 }
 0x308   : > { %v914_v13 = vsel %vm877_vm0, %v913_v12, 0.0 }
 0x309   : > { %v916_v14 = vsel %vm915_vm2, %v914_v13, 0.0 }
 0x30a   : > { %917 = vadd.xlane.f32.xlu1 %v916_v14 }
 0x393   : > { %v918_v15 = vpop.xlane.xlu1 %917 }
 0x394   : > { %v919_v16 = vrot.slane %v918_v15, 4 }
 0x396   : > { %v920_v17 = vadd.f32 %v919_v16, %v918_v15 }
 0x398   : > { %v921_v18 = vrot.slane %v920_v17, 2 }
 0x39a   : > { %v922_v19 = vadd.f32 %v921_v18, %v920_v17 }
 0x39c   : > { %v923_v20 = vrot.slane %v922_v19, 1 }
 0x39e   : > { %v924_v21 = vadd.f32 %v923_v20, %v922_v19 }
 0x3a0   : > { %1207 = vpush %v924_v21 }
 0x3d1   : > { %s1208_s22 = spop %1207 }
 0x3d2   : > { %v926_v22 = vstv %s1208_s22 }
 0x3d3   : > { %927 = vst [vmem:[%s205_s29] sm:$0xff] %v926_v22 }
 0x3d4   : > { %1319 = shalt.err (!%p1316_p3)
}
 0x3d5   : > { %s1320_s9 = scalar_lea.hbm %s940_s28, 128  ;;  %s1324_s10 = scalar_lea.hbm %s1827_s4, 256 }
 0x3d6   : > { %p1321_p4 = scmp.ne.s32.totalorder %s940_s28, %s1320_s9  ;;  %p1325_p9 = scmp.lt.s32.totalorder %s940_s28, %s1827_s4 }
 0x3d7   : > { %p1326_p10 = scmp.lt.s32.totalorder %s1324_s10, %s1320_s9 }
 0x3d8   : > { %p1322_p7 = pnand %p1321_p4, %p1432_p5 }
 0x3d9   : > { %p1327_p11 = por %p1326_p10, %p1325_p9 }
 0x3da   : > { %p1323_p8 = pneg %p1322_p7 }
 0x3dc   : > { %p1328_p12 = pnand %p1327_p11, %p1323_p8 }
 0x3de   : > { %1331 = shalt.err (!%p1328_p12)
}
 0x3df   : > { %1209 = dma.vmem_to_hbm [thread:$0]  (%p1432_p5), %s1785_s13, 128, %s940_s28, %s929_s30  }
 0x3e0 PF: > { %p1215_p13 = scmp.ge.s32.totalorder %s1366_s18, 2  ;;  %s954_s29 = sand.u32 1, %s1354_s15  }
 0x3e1   : > { %s955_s14 = scalar_lea.sflag [#allocation3], %s954_s29 }
 0x3e2   : > { %p1212_p0 = pnand %p1215_p13, %p1436_p6 }
 0x3e4   : > { %p1213_p1 = pneg %p1212_p0 }
 0x3e6   : > { %1349 = dma.done.wait (%p1213_p1), %s955_s14, 128  }
 0x3e7   : > { %1351 = vsyncadd (%p1213_p1), %s955_s14, 4294967168  ;;  %p14_p2 = scmp.ge.s32.totalorder %s1419_s21, 4   ;;  %s1830_s15 = smov %s1358_s16 }
 0x3e8   : > { %s1831_s16 = smov %s1362_s17  ;;  %s1832_s17 = smov %s1430_s24 }
 0x3e9   : > { %s1833_s18 = smov %s1419_s21  ;;  %16 = sbr.rel (!%p14_p2) target bundleno = 3 (0x3), region = 74 }
 0x3ee   :  { %960 = vsyncpa [#allocation3], 1 }
 0x3ef   :  { %962 = vsyncpa [#allocation3 + $0x1], 1 }

</bundles_post_ra>
